<compile_context>
chip_gen: v7x
topology: tpu7x:2x2x1
jax: 0.10.0
libtpu: 0.0.40
codegen_flags: <defaults>
</compile_context>

<pallas_src>
import math

import jax
import jax.numpy as jnp
from jax.experimental import pallas as pl
from jax.experimental.pallas import tpu as pltpu


def _make_gather_kernel(num_indices: int, ring: int):
    """Build an HBM->HBM gather kernel for a static K and DMA-ring depth."""

    def kernel(idx_ref, x_hbm, o_hbm, copy_sems):
        # idx_ref   : (K,) int32 in SMEM (scalar prefetch)
        # x_hbm     : (B, C, HW) raw HBM ref (pl.ANY)
        # o_hbm     : (B, K, HW) raw HBM ref (pl.ANY)
        # copy_sems : (ring,) DMA semaphores

        def copy_desc(src_c, dst_k, slot):
            # One (B, 1, HW) strided slab copy, HBM -> HBM.
            return pltpu.make_async_copy(
                x_hbm.at[:, pl.ds(src_c, 1), :],
                o_hbm.at[:, pl.ds(dst_k, 1), :],
                copy_sems.at[slot],
            )

        @pl.loop(0, num_indices)
        def _(j):
            slot = j % ring

            # Before reusing a semaphore slot, retire the copy issued `ring`
            # iterations ago.  The wait descriptor only needs matching sizes
            # and the same semaphore, so static (0, 0) indices are fine.
            @pl.when(j >= ring)
            def _():
                copy_desc(0, 0, slot).wait()

            # Data-dependent source channel from the SMEM index buffer.
            copy_desc(idx_ref[j], j, slot).start()

        # Drain the (at most `ring`) copies still in flight before returning.
        @pl.loop(max(num_indices - ring, 0), num_indices)
        def _(j):
            copy_desc(0, 0, j % ring).wait()

    return kernel


def index_select_dim1(x: jax.Array, index: jax.Array) -> jax.Array:
    """Equivalent of torch.index_select(x, dim=1, index=index).

    x:     [B, C, *rest]  (any dtype, rank >= 2)
    index: [K] int32, values expected in [0, C)
    returns [B, K, *rest]
    """
    if x.ndim < 2:
        raise ValueError("index_select_dim1 expects an input of rank >= 2")

    B, C = x.shape[0], x.shape[1]
    rest = x.shape[2:]
    K = int(index.shape[0])

    # Clamp to a valid channel so an out-of-range index cannot trigger an
    # out-of-bounds DMA.  (torch.index_select would raise instead.)
    index = jnp.clip(jnp.asarray(index, dtype=jnp.int32), 0, C - 1)

    # Collapse trailing dims into one last axis; pure row-major reshape, no
    # HBM data movement.  Lane alignment is irrelevant here because the copy
    # is a raw HBM->HBM DMA (no VMEM tiles, no vector stores).
    HW = int(math.prod(rest)) if rest else 1
    x3 = x.reshape(B, C, HW)

    # Up to `ring` gather DMAs in flight at once.
    ring = max(1, min(8, K))

    grid_spec = pltpu.PrefetchScalarGridSpec(
        num_scalar_prefetch=1,
        grid=(1,),  # single step: all copies issued/drained in one invocation
        in_specs=[pl.BlockSpec(memory_space=pl.ANY)],
        out_specs=pl.BlockSpec(memory_space=pl.ANY),
        scratch_shapes=[pltpu.SemaphoreType.DMA((ring,))],
    )

    itemsize = jnp.dtype(x.dtype).itemsize
    out3 = pl.pallas_call(
        _make_gather_kernel(K, ring),
        out_shape=jax.ShapeDtypeStruct((B, K, HW), x.dtype),
        grid_spec=grid_spec,
        compiler_params=pltpu.CompilerParams(
            dimension_semantics=("arbitrary",),
        ),
        cost_estimate=pl.CostEstimate(
            flops=0,
            transcendentals=0,
            bytes_accessed=2 * B * K * HW * itemsize,
        ),
    )(index, x3)

    return out3.reshape((B, K) + rest)


class IndexSelector:
    """JAX/Pallas port of the PyTorch IndexSelector module."""

    def __init__(self, *index):
        # Deterministic "buffer" initialization, mirroring register_buffer.
        self.index = jnp.asarray(index, dtype=jnp.int32)

    def __call__(self, x):
        return index_select_dim1(x, self.index)


if __name__ == "__main__":
    key = jax.random.PRNGKey(0)
    B, C, H, W = 2, 4, 16, 16
    x = jax.random.normal(key, (B, C, H, W), dtype=jnp.float32)

    # Static indices chosen at construction time (like the torch buffer).
    selector = IndexSelector(2, 0, 3)

    out = selector(x)
    out = jax.block_until_ready(out)

    # Reference check against plain JAX take along dim 1.
    ref = jnp.take(x, selector.index, axis=1)
    assert out.shape == (B, 3, H, W), out.shape
    assert jnp.array_equal(out, ref), "mismatch vs reference gather"

    print("KERNEL_OK")
</pallas_src>

<mosaic_0001>
module attributes {stable_mosaic.version = 11 : i64} {
  func.func @kernel(%arg0: i32, %arg1: memref<3xi32, #tpu.memory_space<smem>>, %arg2: memref<2x4x256xf32, #tpu.memory_space<any>>, %arg3: memref<2x3x256xf32, #tpu.memory_space<any>>, %arg4: memref<3x!tpu.dma_semaphore, #tpu.memory_space<semaphore_mem>>) attributes {dimension_semantics = [#tpu.dimension_semantics<arbitrary>], iteration_bounds = array<i64: 1>, scalar_prefetch = 1 : i64, scratch_operands = 1 : i64, tpu.core_type = #tpu.core_type<tc>, window_params = [{}, {}]} {
    %c0_i32 = arith.constant 0 : i32
    %c3_i32 = arith.constant 3 : i32
    %0 = arith.addi %c0_i32, %c3_i32 : i32
    %c1_i32 = arith.constant 1 : i32
    scf.for %arg5 = %c0_i32 to %0 step %c1_i32  : i32 {
      %c1_i32_5 = arith.constant 1 : i32
      %2 = arith.muli %arg5, %c1_i32_5 : i32
      %c0_i32_6 = arith.constant 0 : i32
      %3 = arith.addi %c0_i32_6, %2 : i32
      %c3_i32_7 = arith.constant 3 : i32
      %c0_i32_8 = arith.constant 0 : i32
      %4 = arith.cmpi eq, %c3_i32_7, %c0_i32_8 : i32
      %c1_i32_9 = arith.constant 1 : i32
      %5 = arith.select %4, %c1_i32_9, %c3_i32_7 : i32
      %6 = arith.remsi %3, %5 : i32
      %c0_i32_10 = arith.constant 0 : i32
      %7 = arith.cmpi ne, %6, %c0_i32_10 : i32
      %c0_i32_11 = arith.constant 0 : i32
      %8 = arith.cmpi slt, %6, %c0_i32_11 : i32
      %c0_i32_12 = arith.constant 0 : i32
      %9 = arith.cmpi slt, %5, %c0_i32_12 : i32
      %10 = arith.xori %8, %9 : i1
      %11 = arith.andi %10, %7 : i1
      %12 = arith.addi %6, %5 : i32
      %13 = arith.select %11, %12, %6 : i32
      %c3_i32_13 = arith.constant 3 : i32
      %14 = arith.cmpi sge, %3, %c3_i32_13 : i32
      %15 = arith.extui %14 : i1 to i32
      %c0_i32_14 = arith.constant 0 : i32
      %16 = arith.cmpi ne, %15, %c0_i32_14 : i32
      scf.if %16 {
        %c0_i32_19 = arith.constant 0 : i32
        %c0_i32_20 = arith.constant 0 : i32
        %c0_i32_21 = arith.constant 0 : i32
        %23 = tpu.memref_slice %arg2[%c0_i32_19, %c0_i32_20, %c0_i32_21] : memref<2x4x256xf32, #tpu.memory_space<any>> -> memref<2x1x256xf32, #tpu.memory_space<any>>
        %c0_i32_22 = arith.constant 0 : i32
        %c0_i32_23 = arith.constant 0 : i32
        %c0_i32_24 = arith.constant 0 : i32
        %24 = tpu.memref_slice %arg3[%c0_i32_22, %c0_i32_23, %c0_i32_24] : memref<2x3x256xf32, #tpu.memory_space<any>> -> memref<2x1x256xf32, #tpu.memory_space<any>>
        %25 = tpu.memref_slice %arg4[%13] : memref<3x!tpu.dma_semaphore, #tpu.memory_space<semaphore_mem>> -> memref<1x!tpu.dma_semaphore, #tpu.memory_space<semaphore_mem>>
        %26 = tpu.memref_squeeze %25 : memref<1x!tpu.dma_semaphore, #tpu.memory_space<semaphore_mem>> -> memref<!tpu.dma_semaphore, #tpu.memory_space<semaphore_mem>>
        tpu.wait_dma2 semaphore(%26 : memref<!tpu.dma_semaphore, #tpu.memory_space<semaphore_mem>>) src(%23 : memref<2x1x256xf32, #tpu.memory_space<any>>) dst(%24 : memref<2x1x256xf32, #tpu.memory_space<any>>)
      } else {
      }
      %17 = arith.index_cast %3 : i32 to index
      %18 = memref.load %arg1[%17] : memref<3xi32, #tpu.memory_space<smem>>
      %c0_i32_15 = arith.constant 0 : i32
      %c0_i32_16 = arith.constant 0 : i32
      %19 = tpu.memref_slice %arg2[%c0_i32_15, %18, %c0_i32_16] : memref<2x4x256xf32, #tpu.memory_space<any>> -> memref<2x1x256xf32, #tpu.memory_space<any>>
      %c0_i32_17 = arith.constant 0 : i32
      %c0_i32_18 = arith.constant 0 : i32
      %20 = tpu.memref_slice %arg3[%c0_i32_17, %3, %c0_i32_18] : memref<2x3x256xf32, #tpu.memory_space<any>> -> memref<2x1x256xf32, #tpu.memory_space<any>>
      %21 = tpu.memref_slice %arg4[%13] : memref<3x!tpu.dma_semaphore, #tpu.memory_space<semaphore_mem>> -> memref<1x!tpu.dma_semaphore, #tpu.memory_space<semaphore_mem>>
      %22 = tpu.memref_squeeze %21 : memref<1x!tpu.dma_semaphore, #tpu.memory_space<semaphore_mem>> -> memref<!tpu.dma_semaphore, #tpu.memory_space<semaphore_mem>>
      tpu.enqueue_dma source(%19 : memref<2x1x256xf32, #tpu.memory_space<any>>) target(%20 : memref<2x1x256xf32, #tpu.memory_space<any>>) target_semaphore(%22 : memref<!tpu.dma_semaphore, #tpu.memory_space<semaphore_mem>>)
    }
    %c3_i32_0 = arith.constant 3 : i32
    %c0_i32_1 = arith.constant 0 : i32
    %c3_i32_2 = arith.constant 3 : i32
    %1 = arith.addi %c0_i32_1, %c3_i32_2 : i32
    %c1_i32_3 = arith.constant 1 : i32
    scf.for %arg5 = %c0_i32_1 to %1 step %c1_i32_3  : i32 {
      %c1_i32_5 = arith.constant 1 : i32
      %2 = arith.muli %arg5, %c1_i32_5 : i32
      %c0_i32_6 = arith.constant 0 : i32
      %3 = arith.addi %c0_i32_6, %2 : i32
      %c3_i32_7 = arith.constant 3 : i32
      %c0_i32_8 = arith.constant 0 : i32
      %4 = arith.cmpi eq, %c3_i32_7, %c0_i32_8 : i32
      %c1_i32_9 = arith.constant 1 : i32
      %5 = arith.select %4, %c1_i32_9, %c3_i32_7 : i32
      %6 = arith.remsi %3, %5 : i32
      %c0_i32_10 = arith.constant 0 : i32
      %7 = arith.cmpi ne, %6, %c0_i32_10 : i32
      %c0_i32_11 = arith.constant 0 : i32
      %8 = arith.cmpi slt, %6, %c0_i32_11 : i32
      %c0_i32_12 = arith.constant 0 : i32
      %9 = arith.cmpi slt, %5, %c0_i32_12 : i32
      %10 = arith.xori %8, %9 : i1
      %11 = arith.andi %10, %7 : i1
      %12 = arith.addi %6, %5 : i32
      %13 = arith.select %11, %12, %6 : i32
      %c0_i32_13 = arith.constant 0 : i32
      %c0_i32_14 = arith.constant 0 : i32
      %c0_i32_15 = arith.constant 0 : i32
      %14 = tpu.memref_slice %arg2[%c0_i32_13, %c0_i32_14, %c0_i32_15] : memref<2x4x256xf32, #tpu.memory_space<any>> -> memref<2x1x256xf32, #tpu.memory_space<any>>
      %c0_i32_16 = arith.constant 0 : i32
      %c0_i32_17 = arith.constant 0 : i32
      %c0_i32_18 = arith.constant 0 : i32
      %15 = tpu.memref_slice %arg3[%c0_i32_16, %c0_i32_17, %c0_i32_18] : memref<2x3x256xf32, #tpu.memory_space<any>> -> memref<2x1x256xf32, #tpu.memory_space<any>>
      %16 = tpu.memref_slice %arg4[%13] : memref<3x!tpu.dma_semaphore, #tpu.memory_space<semaphore_mem>> -> memref<1x!tpu.dma_semaphore, #tpu.memory_space<semaphore_mem>>
      %17 = tpu.memref_squeeze %16 : memref<1x!tpu.dma_semaphore, #tpu.memory_space<semaphore_mem>> -> memref<!tpu.dma_semaphore, #tpu.memory_space<semaphore_mem>>
      tpu.wait_dma2 semaphore(%17 : memref<!tpu.dma_semaphore, #tpu.memory_space<semaphore_mem>>) src(%14 : memref<2x1x256xf32, #tpu.memory_space<any>>) dst(%15 : memref<2x1x256xf32, #tpu.memory_space<any>>)
    }
    %c3_i32_4 = arith.constant 3 : i32
    return
  }
}

</mosaic_0001>

<bundles_post_ra>
// kernel: tpu_custom_call.1
= control target key start
LH: loop header
LB: loop body
LE: loop exit
PB: predicated region body
PF: predicated region fallthrough
CT: control target
= control target key end

     0   :  { %s291_s0 = inlined_call_operand.hbm [shape: s32[3], index: 0, kind: input, shape index: {}]   ;;  %s292_s1 = inlined_call_operand.hbm [shape: f32[2,4,256], index: 1, kind: input, shape index: {}]   ;;  %s293_s2 = inlined_call_operand.vmem [shape: f32[2,3,256], index: 2, kind: output, shape index: {}]  }
   0x1   :  { %s162_s11 = scalar_lea.hbm %s291_s0, 16 }
   0x2   :  { %p163_p0 = scmp.ne.s32.totalorder %s291_s0, %s162_s11  ;;  %p166_p1 = scmp.lt.u32.totalorder %s162_s11, %s291_s0 }
   0x4   :  { %p168_p2 = pnand %p166_p1, %p163_p0 }
   0x6   :  { %171 = shalt.err (!%p168_p2)  }
   0x7   :  { %s220_s16 = smov [#allocation4]  }
   0x8   :  { %8 = dma.hbm_to_smem %s291_s0, 16, %s220_s16, [#allocation3] }
   0x9   :  { %204 = dma.done.wait [#allocation3], 16 }
   0xa   :  { %205 = vsyncadd [#allocation3], 4294967280 }
   0xb   :  { %10 = sfence }
   0xc   :  { %s250_s19 = smov 0  }
   0xd LB: > { %s18_s20 = ssub.s32 0, %s214_s19  ;;  %p136_p3 = scmp.ge.s32.totalorder %s214_s19, 3  ;;  %s214_s19 = sphi %s250_s19, %s16_s19  }
   0xe   : > { %s121_s21 = smin.u32 %s214_s19, %s18_s20  ;;  %p17_p4 = scmp.lt.s32.totalorder %s214_s19, 0 }
   0xf   : > { %158 = sdivrem.u32 %s121_s21, 3 }
  0x18   : > { %s159_s0 = spop.drf %158 }
  0x19   : > { %s22_s22 = ssub.s32 0, %s159_s0 }
  0x1a   : > { %s295_s22 = smov (!%p17_p4, %s22_s22), %s159_s0 }
  0x1b   : > { %p123_p5 = scmp.lt.s32.totalorder %s295_s22, 0  ;;  %s28_s23 = sadd.s32 3, %s295_s22 }
  0x1d   : > { %s297_s23 = smov (!%p123_p5, %s28_s23), %s295_s22 }
  0x1e   : > { %s259_s24 = scalar_lea.sflag [#allocation2], %s297_s23 }
  0x1f   : > { %207 = dma.done.wait (%p136_p3), %s259_s24, 64 }
  0x20   : > { %209 = vsyncadd (%p136_p3), %s259_s24, 4294967232  ;;  %s46_s25 = sshrl.u32 %s214_s19, 2  ;;  %s47_s26 = sand.u32 3, %s214_s19  }
  0x21   : > { %s39_s27 = sld [smem:[#allocation4 + %s214_s19]]  ;;  %s127_s28 = sshll.u32 %s46_s25, 3 }
  0x22   : > { %s49_s29 = sadd.s32 %s127_s28, %s47_s26  ;;  %s174_s17 = scalar_lea.hbm %s292_s1, 256 }
  0x23   : > { %s50_s4 = scalar_lea.vmem %s293_s2, %s49_s29 }
  0x24   : > { %s53_s5 = sshll.u32 %s50_s4, 4  ;;  %s269_s5 = int_to_ptr.vmem [resolvable:$true] %s53_s5 }
  0x27   : > { %s40_s6 = sshrl.u32 %s39_s27, 2  ;;  %s41_s7 = sand.u32 3, %s39_s27  }
  0x28   : > { %s125_s8 = sshll.u32 %s40_s6, 3 }
  0x29   : > { %s43_s9 = sadd.s32 %s125_s8, %s41_s7 }
  0x2a   : > { %s126_s10 = sshll.u32 %s43_s9, 4 }
  0x2b   : > { %s45_s13 = scalar_lea.hbm %s292_s1, %s126_s10 }
  0x2c   : > { %s172_s14 = scalar_lea.hbm %s45_s13, 64  ;;  %p175_p7 = scmp.lt.u32.totalorder %s45_s13, %s292_s1 }
  0x2d   : > { %p173_p6 = scmp.ne.s32.totalorder %s45_s13, %s172_s14  ;;  %p176_p8 = scmp.lt.u32.totalorder %s174_s17, %s172_s14 }
  0x2e   : > { %p178_p10 = scmp.lt.u32.totalorder %s172_s14, %s45_s13 }
  0x2f   : > { %p177_p9 = por %p176_p8, %p175_p7 }
  0x31   : > { %p179_p11 = por %p178_p10, %p177_p9 }
  0x33   : > { %p180_p12 = pnand %p179_p11, %p173_p6 }
  0x35   : > { %183 = shalt.err (!%p180_p12)  }
  0x36   : > { %s184_s21 = scalar_lea.vmem %s269_s5, 64  ;;  %s186_s23 = sshll.u32 %s293_s2, 4  ;;  %s187_s23 = int_to_ptr.vmem [resolvable:$false] %s186_s23 }
  0x37   : > { %p185_p13 = scmp.ne.s32.totalorder %s269_s5, %s184_s21  ;;  %s188_s25 = scalar_lea.vmem %s187_s23, 256 }
  0x38   : > { %p189_p0 = scmp.lt.s32.totalorder %s269_s5, %s187_s23  ;;  %p190_p1 = scmp.lt.s32.totalorder %s188_s25, %s184_s21 }
  0x3a   : > { %p191_p2 = por %p190_p1, %p189_p0 }
  0x3c   : > { %p192_p3 = pnand %p191_p2, %p185_p13 }
  0x3e   : > { %195 = shalt.err (!%p192_p3)  }
  0x3f   : > { %s221_s26 = smov 64   ;;  %s222_s27 = smov 1  }
  0x40   : > { %56 = dma.hbm_to_vmem [thread:$0]  %s45_s13, 64, %s269_s5, %s259_s24, %s221_s26, %s221_s26, %s222_s27 }
  0x41   : > { %s16_s19 = sadd.s32 1, %s214_s19  }
  0x42   : > { %p13_p4 = scmp.ge.s32.totalorder %s16_s19, 3  }
  0x43   :  { %s216_s28 = smov (%p13_p4), 0  }
  0x44   :  { %15 = sbr.rel (!%p13_p4) target bundleno = 13 (0xd), region = 37 }
  0x4b LB: > { %s64_s29 = ssub.s32 0, %s218_s28  ;;  %p63_p5 = scmp.lt.s32.totalorder %s218_s28, 0  ;;  %s218_s28 = sphi %s216_s28, %s62_s28  }
  0x4c   : > { %s128_s30 = smin.u32 %s218_s28, %s64_s29 }
  0x4d   : > { %160 = sdivrem.u32 %s128_s30, 3 }
  0x56   : > { %s161_s3 = spop.drf %160 }
  0x57   : > { %s68_s4 = ssub.s32 0, %s161_s3 }
  0x58   : > { %s299_s4 = smov (!%p63_p5, %s68_s4), %s161_s3 }
  0x59   : > { %p130_p6 = scmp.lt.s32.totalorder %s299_s4, 0  ;;  %s74_s6 = sadd.s32 3, %s299_s4 }
  0x5b   : > { %s301_s6 = smov (!%p130_p6, %s74_s6), %s299_s4 }
  0x5c   : > { %s76_s24 = scalar_lea.sflag [#allocation2], %s301_s6 }
  0x5d   : > { %210 = dma.done.wait %s76_s24, 64 }
  0x5e   : > { %211 = vsyncadd %s76_s24, 4294967232  ;;  %s62_s28 = sadd.s32 1, %s218_s28  }
  0x5f   : > { %p59_p7 = scmp.ge.s32.totalorder %s62_s28, 3  }
  0x61   :  { %61 = sbr.rel (!%p59_p7) target bundleno = 75 (0x4b), region = 48 }
  0x68   :  { %81 = vsyncmov [#allocation2] }
  0x6b   :  { %s82_s1 = vpop.sfrf %81 }
  0x6c   :  { %p131_p8 = scmp.ne.s32.totalorder %s82_s1, 0 }
  0x6e   :  { %86 = shalt.err (%p131_p8)  }
  0x6f   :  { %88 = vsyncmov [#allocation2 + $0x1] }
  0x72   :  { %s89_s2 = vpop.sfrf %88 }
  0x73   :  { %p132_p9 = scmp.ne.s32.totalorder %s89_s2, 0 }
  0x75   :  { %93 = shalt.err (%p132_p9)  }
  0x76   :  { %95 = vsyncmov [#allocation2 + $0x2] }
  0x79   :  { %s96_s19 = vpop.sfrf %95 }
  0x7a   :  { %p133_p10 = scmp.ne.s32.totalorder %s96_s19, 0 }
  0x7c   :  { %100 = shalt.err (%p133_p10)  }

</bundles_post_ra>
